<compile_context>
chip_gen: v7x
topology: tpu7x:2x2x1
jax: 0.10.0
libtpu: 0.0.40
codegen_flags: <defaults>
</compile_context>

<pallas_src>
import jax
import jax.numpy as jnp
from jax import lax
from jax.experimental import pallas as pl
from jax.experimental.pallas import tpu as pltpu

EPS = 1e-6      # clamp epsilon from MultiHeadGeMSEDPooling
LANE = 128      # TPU lane width


# --------------------------------------------------------------------------
# Small static helpers (host-side, trace time)
# --------------------------------------------------------------------------
def _round_up(x, m):
    return ((x + m - 1) // m) * m


def _pick_batch_block(b):
    """Batch elements folded per grid step (into the matmul M dim) while keeping
    >= 2 grid steps when possible so v7x's two TensorCores both get work."""
    if b <= 1:
        return 1
    target = max(1, b // 2)
    for bb in range(target, 0, -1):
        if b % bb == 0:
            return bb
    return 1


def _pick_f_block(f, row_bytes, budget=4 * 1024 * 1024):
    """Largest divisor of F (a multiple of 8, or F itself) whose x block fits
    `budget`, so the auto-pipeline's double buffer stays well inside VMEM
    (64 MiB on v7x) without needing a raised scoped limit."""
    cands = [d for d in range(1, f + 1) if f % d == 0 and (d % 8 == 0 or d == f)]
    fits = [d for d in cands if d * row_bytes <= budget]
    return max(fits) if fits else min(cands)


def _make_static_pow(p):
    """x**p for the (static) GeM exponent: VPU multiplies for small integer p
    (default p=3) instead of two EUP transcendentals per element of (B,C,F,T)."""
    p = float(p)
    n = int(round(p))
    if abs(p - n) < 1e-12 and 1 <= n <= 4:
        def powp(x):
            y = x
            for _ in range(n - 1):
                y = y * x
            return y
    else:
        def powp(x):
            return jnp.exp(p * jnp.log(x))
    return powp


# --------------------------------------------------------------------------
# Pallas kernel: one MultiHeadGeMSEDPooling head.
# grid = (batch blocks [parallel], F tiles [arbitrary]).
# --------------------------------------------------------------------------
def _make_gem_sed_kernel(*, bb, n_ch, f_total, t, hd, num_heads, out_dim, d_pad,
                         powp, inv_p):
    c = n_ch

    def kernel(x_ref,      # VMEM (bb, C, fb, T)  feature tile (any float dtype)
               w1_ref,     # VMEM (C, C)          conv1x1 weight^T with BN folded
               s1_ref,     # VMEM (1, C)          folded conv bias + BN shift
               w2_ref,     # VMEM (C, n_pad)      subspace proj^T, head-wt folded, padded
               b2_ref,     # VMEM (1, n_pad)      subspace proj bias (folded, padded)
               acc_ref,    # VMEM (1, bb, d_pad)  running per-scale logit slab (aliased)
               out_ref,    # VMEM (1, bb, d_pad)  output logit slab
               gacc_ref):  # VMEM (bb*C, T)       GeM partial-sum accumulator (scratch)
        j = pl.program_id(1)

        # ---- GeM partial sum over this F tile:  sum_f clamp(x, eps)^p ----
        x = x_ref[...].astype(jnp.float32)                   # upcast (bf16 inputs OK)
        part = jnp.sum(powp(jnp.maximum(x, EPS)), axis=2)    # (bb, C, T)
        part = part.reshape(bb * c, t)

        @pl.when(j == 0)
        def _init():
            gacc_ref[...] = jnp.zeros_like(gacc_ref)

        gacc_ref[...] += part

        # ---- everything past the GeM reduction runs once, on the last F tile ----
        @pl.when(j == pl.num_programs(1) - 1)
        def _finish():
            g = gacc_ref[...] * (1.0 / f_total)               # mean over F
            g = jnp.exp(jnp.log(g) * inv_p)                   # ^(1/p)     (bb*C, T)

            # 3-tap max/avg pooling over time (lane axis), k=3, stride=1, pad=1.
            # Shifted views are built with static lane slices; the boundary replicas
            # (prev[0]=g[0], nxt[-1]=g[-1]) are harmless for the max, and the avg
            # masks them to zero (count_include_pad=True divides by 3 everywhere).
            lane = lax.broadcasted_iota(jnp.int32, (bb * c, t), 1)
            first = lane == 0
            last = lane == (t - 1)
            if t > 1:
                prev = jnp.concatenate([g[:, :1], g[:, : t - 1]], axis=1)  # g[t-1]
                nxt = jnp.concatenate([g[:, 1:], g[:, t - 1:]], axis=1)    # g[t+1]
            else:
                prev = g
                nxt = g
            x1 = jnp.maximum(jnp.maximum(prev, g), nxt)
            x2 = (jnp.where(first, 0.0, prev) + g
                  + jnp.where(last, 0.0, nxt)) * (1.0 / 3.0)
            pooled = x1 + x2                                   # (bb*C, T)

            # (bb, C, T) -> (bb*T, C): channels onto the lane axis for the matmuls.
            h = jnp.transpose(pooled.reshape(bb, c, t), (0, 2, 1)).reshape(bb * t, c)

            # conv1x1 (BatchNorm folded in) + ReLU.
            h = jnp.dot(h, w1_ref[...], preferred_element_type=jnp.float32)
            h = jnp.maximum(h + s1_ref[...], 0.0)              # (bb*T, C)

            # Subspace projection (head weights pre-folded into the cla columns).
            z = jnp.dot(h, w2_ref[...], preferred_element_type=jnp.float32)
            z = z + b2_ref[...]                                # (bb*T, n_pad)
            att = z[:, :hd]
            cla = z[:, hd:2 * hd]
            prod = att * cla                                   # (bb*T, H*D)

            v = jnp.sum(prod.reshape(bb, t, hd), axis=1)       # sum over time -> (bb, H*D)
            logit = v[:, 0:out_dim]
            for head in range(1, num_heads):                   # sum over heads (VPU)
                logit = logit + v[:, head * out_dim:(head + 1) * out_dim]

            if d_pad > out_dim:                                # lane-dense output slab
                logit = jnp.concatenate(
                    [logit, jnp.zeros((bb, d_pad - out_dim), jnp.float32)], axis=1)
            out_ref[0] = acc_ref[0] + logit                    # accumulate across scales

    return kernel


def gem_sed_pool_logits(x, pp, num_heads, out_dim, acc):
    """One MultiHeadGeMSEDPooling head.  x: (B, C, F, T).  Adds its logits into the
    running (nb, bb, d_pad) slab `acc` in place (input_output_aliases)."""
    b, c, f, t = x.shape
    hd = num_heads * out_dim
    nb, bb, d_pad = acc.shape
    assert nb * bb == b
    n_pad = pp["w2_eff"].shape[1]

    fb = _pick_f_block(f, bb * c * t * x.dtype.itemsize)
    nf = f // fb

    kernel = _make_gem_sed_kernel(
        bb=bb, n_ch=c, f_total=float(f), t=t, hd=hd, num_heads=num_heads,
        out_dim=out_dim, d_pad=d_pad,
        powp=_make_static_pow(pp["p"]), inv_p=1.0 / float(pp["p"]))

    # Raise the scoped-VMEM limit only when the (double-buffered) blocks need it,
    # staying under v7x's 64 MiB physical VMEM.
    blk_bytes = bb * c * fb * t * x.dtype.itemsize
    w_bytes = (c * c + c + c * n_pad + n_pad) * 4
    io_bytes = 2 * bb * d_pad * 4
    scr_bytes = bb * c * t * 4
    need = 2 * (blk_bytes + w_bytes + io_bytes) + scr_bytes + (4 << 20)
    vmem_limit = int(min(need, 60 << 20)) if need > (32 << 20) else None

    return pl.pallas_call(
        kernel,
        out_shape=jax.ShapeDtypeStruct((nb, bb, d_pad), jnp.float32),
        grid_spec=pltpu.PrefetchScalarGridSpec(
            num_scalar_prefetch=0,
            grid=(nb, nf),                                        # (batch blocks, F tiles)
            in_specs=[
                pl.BlockSpec((bb, c, fb, t), lambda i, j: (i, 0, j, 0)),  # x (native layout)
                pl.BlockSpec((c, c), lambda i, j: (0, 0)),                # conv1x1^T (BN folded)
                pl.BlockSpec((1, c), lambda i, j: (0, 0)),                # folded shift
                pl.BlockSpec((c, n_pad), lambda i, j: (0, 0)),            # proj^T (hw folded)
                pl.BlockSpec((1, n_pad), lambda i, j: (0, 0)),            # proj bias
                pl.BlockSpec((1, bb, d_pad), lambda i, j: (i, 0, 0)),     # running logits
            ],
            out_specs=pl.BlockSpec((1, bb, d_pad), lambda i, j: (i, 0, 0)),
            scratch_shapes=[pltpu.VMEM((bb * c, t), jnp.float32)],        # GeM accumulator
        ),
        input_output_aliases={5: 0},          # accumulate per-scale logits in place
        compiler_params=pltpu.CompilerParams(
            dimension_semantics=("parallel", "arbitrary"),
            vmem_limit_bytes=vmem_limit),
    )(x, pp["w1_eff"], pp["shift1"], pp["w2_eff"], pp["b2_eff"], acc)


def audio_ms_classifier_forward(ms, pool_params, num_heads, n_classes):
    """AudioMSMultiHeadGeMSEDClassifier.forward on backbone features `ms`."""
    b = ms[0].shape[0]
    bb = _pick_batch_block(b)
    d_pad = _round_up(n_classes, LANE)
    acc = jnp.zeros((b // bb, bb, d_pad), jnp.float32)
    for m, pp in zip(ms, pool_params):
        acc = gem_sed_pool_logits(m, pp, num_heads, n_classes, acc)
    return acc.reshape(b, d_pad)[:, :n_classes]


# --------------------------------------------------------------------------
# Parameter init (mirrors MultiHeadGeMSEDPooling.__init__), with the folded /
# padded "effective" parameters the kernel consumes precomputed once.
# --------------------------------------------------------------------------
def init_pool_params(key, n_channels, out_dim, num_heads, p=3.0):
    c = n_channels
    hd = num_heads * out_dim
    k1, k2, k3, k4 = jax.random.split(key, 4)
    bound = 1.0 / (c ** 0.5)

    # Conv1d(C, C, 1): weight (C_out, C_in), bias (C_out,)
    w1 = jax.random.uniform(k1, (c, c), jnp.float32, -bound, bound)
    b1 = jax.random.uniform(k2, (c,), jnp.float32, -bound, bound)

    # BatchNorm1d(C), default init + running stats, eval mode -> scale/shift.
    gamma = jnp.ones((c,), jnp.float32)
    beta = jnp.zeros((c,), jnp.float32)
    r_mean = jnp.zeros((c,), jnp.float32)
    r_var = jnp.ones((c,), jnp.float32)
    bn_scale = gamma / jnp.sqrt(r_var + 1e-5)
    bn_shift = beta - r_mean * bn_scale

    # Linear(C, 2*H*D): weight (2HD, C), bias (2HD,)
    w2 = jax.random.uniform(k3, (2 * hd, c), jnp.float32, -bound, bound)
    b2 = jax.random.uniform(k4, (2 * hd,), jnp.float32, -bound, bound)

    head_weight = jnp.full((num_heads,), 1.0 / num_heads, jnp.float32)

    # ---- folded / effective kernel parameters ----
    w1_eff = w1.T * bn_scale[None, :]                      # conv^T with BN scale folded
    shift1 = (b1 * bn_scale + bn_shift)[None, :]           # (1, C)
    col_scale = jnp.concatenate(
        [jnp.ones((hd,), jnp.float32), jnp.repeat(head_weight, out_dim)])
    w2_eff = w2.T * col_scale[None, :]                     # head weights into cla columns
    b2_eff = (b2 * col_scale)[None, :]
    n_pad = _round_up(2 * hd, LANE)                        # lane-dense projection width
    if n_pad > 2 * hd:
        w2_eff = jnp.pad(w2_eff, ((0, 0), (0, n_pad - 2 * hd)))
        b2_eff = jnp.pad(b2_eff, ((0, 0), (0, n_pad - 2 * hd)))

    return dict(
        # raw parameters (used by the pure-JAX reference)
        p=float(p), w1=w1, b1=b1, bn_scale=bn_scale, bn_shift=bn_shift,
        w2=w2, b2=b2, head_weight=head_weight,
        # folded parameters (used by the kernel)
        w1_eff=w1_eff, shift1=shift1, w2_eff=w2_eff, b2_eff=b2_eff,
    )


# --------------------------------------------------------------------------
# Pure-JAX reference (mirrors the PyTorch forward math) for validation
# --------------------------------------------------------------------------
def _pool_ref(x, pp, num_heads, out_dim):
    x = x.astype(jnp.float32)
    b, c, f, t = x.shape
    p = pp["p"]
    g = jnp.mean(jnp.maximum(x, EPS) ** p, axis=2) ** (1.0 / p)          # (B, C, T)
    gpn = jnp.pad(g, ((0, 0), (0, 0), (1, 1)), constant_values=-jnp.inf)
    x1 = jnp.maximum(jnp.maximum(gpn[:, :, :-2], gpn[:, :, 1:-1]), gpn[:, :, 2:])
    gp0 = jnp.pad(g, ((0, 0), (0, 0), (1, 1)))
    x2 = (gp0[:, :, :-2] + gp0[:, :, 1:-1] + gp0[:, :, 2:]) / 3.0
    xs = x1 + x2                                                         # (B, C, T)
    y = jnp.einsum("oc,bct->bot", pp["w1"], xs) + pp["b1"][None, :, None]
    y = y * pp["bn_scale"][None, :, None] + pp["bn_shift"][None, :, None]
    y = jnp.maximum(y, 0.0)
    h = jnp.transpose(y, (0, 2, 1))                                      # (B, T, C)
    z = h @ pp["w2"].T + pp["b2"]                                        # (B, T, 2HD)
    z = jnp.transpose(z.reshape(b, t, 2, num_heads, out_dim), (2, 0, 3, 1, 4))
    att, cla = z[0], z[1]                                                # (B, H, T, D)
    logit = jnp.sum(att * cla, axis=2) * pp["head_weight"][None, :, None]
    return jnp.sum(logit, axis=1)                                        # (B, D)


def _classifier_ref(ms, pool_params, num_heads, n_classes):
    out = None
    for m, pp in zip(ms, pool_params):
        l = _pool_ref(m, pp, num_heads, n_classes)
        out = l if out is None else out + l
    return out


if __name__ == "__main__":
    key = jax.random.PRNGKey(0)
    B = 2
    n_classes = 8
    num_heads = 4
    # Scaled-down analogue of feature_dims = [80*w, 112*w, 960*w] at 3 scales.
    feature_dims = (16, 24, 32)
    spatial = ((8, 16), (8, 16), (4, 8))            # (F, T) per scale

    k_feat, k_par = jax.random.split(key)
    ms = []
    for i, (c, (f, t)) in enumerate(zip(feature_dims, spatial)):
        kf = jax.random.fold_in(k_feat, i)
        feat = jnp.abs(jax.random.normal(kf, (B, c, f, t), jnp.float32))
        ms.append(feat.astype(jnp.bfloat16))        # backbone features stored in bf16

    pool_params = [
        init_pool_params(jax.random.fold_in(k_par, i), c, n_classes, num_heads)
        for i, c in enumerate(feature_dims)
    ]

    out = audio_ms_classifier_forward(ms, pool_params, num_heads, n_classes)
    out = jax.block_until_ready(out)

    ref = _classifier_ref(ms, pool_params, num_heads, n_classes)
    assert out.shape == (B, n_classes)
    assert jnp.allclose(out, ref, rtol=1e-2, atol=1e-2), (out, ref)

    print("KERNEL_OK")
</pallas_src>

<mosaic_0001>
module attributes {stable_mosaic.version = 11 : i64} {
  func.func @kernel(%arg0: i32, %arg1: i32, %arg2: memref<1x16x8x16xbf16, #tpu.memory_space<vmem>>, %arg3: memref<16x16xf32, #tpu.memory_space<vmem>>, %arg4: memref<1x16xf32, #tpu.memory_space<vmem>>, %arg5: memref<16x128xf32, #tpu.memory_space<vmem>>, %arg6: memref<1x128xf32, #tpu.memory_space<vmem>>, %arg7: memref<1x1x128xf32, #tpu.memory_space<vmem>>, %arg8: memref<1x1x128xf32, #tpu.memory_space<vmem>>, %arg9: memref<16x16xf32, #tpu.memory_space<vmem>>) attributes {dimension_semantics = [#tpu.dimension_semantics<parallel>, #tpu.dimension_semantics<arbitrary>], iteration_bounds = array<i64: 2, 1>, scalar_prefetch = 0 : i64, scratch_operands = 1 : i64, tpu.core_type = #tpu.core_type<tc>, window_params = [{transform_indices = @transform_0, window_bounds = array<i64: 1, 16, 8, 16>}, {pipeline_mode = #tpu.pipeline_mode<synchronous>, transform_indices = @transform_1, window_bounds = array<i64: 16, 16>}, {pipeline_mode = #tpu.pipeline_mode<synchronous>, transform_indices = @transform_2, window_bounds = array<i64: 1, 16>}, {pipeline_mode = #tpu.pipeline_mode<synchronous>, transform_indices = @transform_3, window_bounds = array<i64: 16, 128>}, {pipeline_mode = #tpu.pipeline_mode<synchronous>, transform_indices = @transform_4, window_bounds = array<i64: 1, 128>}, {transform_indices = @transform_5, window_bounds = array<i64: 1, 1, 128>}, {transform_indices = @transform_6, window_bounds = array<i64: 1, 1, 128>}]} {
    %c0 = arith.constant 0 : index
    %c0_0 = arith.constant 0 : index
    %c0_1 = arith.constant 0 : index
    %c0_2 = arith.constant 0 : index
    %0 = vector.load %arg2[%c0, %c0_0, %c0_1, %c0_2] : memref<1x16x8x16xbf16, #tpu.memory_space<vmem>>, vector<1x16x8x16xbf16>
    %1 = arith.extf %0 : vector<1x16x8x16xbf16> to vector<1x16x8x16xf32>
    %cst = arith.constant 9.99999997E-7 : f32
    %2 = vector.broadcast %cst : f32 to vector<1x16x8x16xf32>
    %3 = arith.maximumf %1, %2 : vector<1x16x8x16xf32>
    %4 = arith.mulf %3, %3 : vector<1x16x8x16xf32>
    %5 = arith.mulf %4, %3 : vector<1x16x8x16xf32>
    %cst_3 = arith.constant dense<0.000000e+00> : vector<1x16x16xf32>
    %6 = vector.multi_reduction <add>, %5, %cst_3 [2] : vector<1x16x8x16xf32> to vector<1x16x16xf32>
    %7 = vector.shape_cast %6 : vector<1x16x16xf32> to vector<16x16xf32>
    %c0_i32 = arith.constant 0 : i32
    %8 = arith.cmpi eq, %arg1, %c0_i32 : i32
    %9 = arith.extui %8 : i1 to i32
    %c0_i32_4 = arith.constant 0 : i32
    %10 = arith.cmpi ne, %9, %c0_i32_4 : i32
    scf.if %10 {
      %cst_11 = arith.constant 0.000000e+00 : f32
      %17 = vector.broadcast %cst_11 : f32 to vector<16x16xf32>
      %c0_12 = arith.constant 0 : index
      %c0_13 = arith.constant 0 : index
      %18 = vector.load %arg9[%c0_12, %c0_13] : memref<16x16xf32, #tpu.memory_space<vmem>>, vector<16x16xf32>
      tpu.vector_store %arg9[%c0_12, %c0_13], %17 {strides = array<i32>} : memref<16x16xf32, #tpu.memory_space<vmem>>, vector<16x16xf32>,
    } else {
    }
    %c0_5 = arith.constant 0 : index
    %c0_6 = arith.constant 0 : index
    %11 = vector.load %arg9[%c0_5, %c0_6] : memref<16x16xf32, #tpu.memory_space<vmem>>, vector<16x16xf32>
    %12 = arith.addf %11, %7 : vector<16x16xf32>
    %c0_7 = arith.constant 0 : index
    %c0_8 = arith.constant 0 : index
    %13 = vector.load %arg9[%c0_7, %c0_8] : memref<16x16xf32, #tpu.memory_space<vmem>>, vector<16x16xf32>
    tpu.vector_store %arg9[%c0_7, %c0_8], %12 {strides = array<i32>} : memref<16x16xf32, #tpu.memory_space<vmem>>, vector<16x16xf32>,
    %c0_i32_9 = arith.constant 0 : i32
    %14 = arith.cmpi eq, %arg1, %c0_i32_9 : i32
    %15 = arith.extui %14 : i1 to i32
    %c0_i32_10 = arith.constant 0 : i32
    %16 = arith.cmpi ne, %15, %c0_i32_10 : i32
    scf.if %16 {
      %c0_11 = arith.constant 0 : index
      %c0_12 = arith.constant 0 : index
      %17 = vector.load %arg9[%c0_11, %c0_12] : memref<16x16xf32, #tpu.memory_space<vmem>>, vector<16x16xf32>
      %cst_13 = arith.constant 1.250000e-01 : f32
      %18 = vector.broadcast %cst_13 : f32 to vector<16x16xf32>
      %19 = arith.mulf %17, %18 : vector<16x16xf32>
      %20 = math.log %19 : vector<16x16xf32>
      %cst_14 = arith.constant 0.333333343 : f32
      %21 = vector.broadcast %cst_14 : f32 to vector<16x16xf32>
      %22 = arith.mulf %20, %21 : vector<16x16xf32>
      %23 = math.exp %22 : vector<16x16xf32>
      %24 = tpu.iota {dimensions = array<i32: 1>} : vector<16x16xi32>
      %c0_i32_15 = arith.constant 0 : i32
      %25 = vector.broadcast %c0_i32_15 : i32 to vector<16x16xi32>
      %26 = arith.cmpi eq, %24, %25 : vector<16x16xi32>
      %c15_i32 = arith.constant 15 : i32
      %27 = vector.broadcast %c15_i32 : i32 to vector<16x16xi32>
      %28 = arith.cmpi eq, %24, %27 : vector<16x16xi32>
      %29 = vector.extract_strided_slice %23 {offsets = [0, 0], sizes = [16, 1], strides = [1, 1]} : vector<16x16xf32> to vector<16x1xf32>
      %30 = vector.extract_strided_slice %23 {offsets = [0, 0], sizes = [16, 15], strides = [1, 1]} : vector<16x16xf32> to vector<16x15xf32>
      %31 = tpu.concatenate %29, %30 in 1 : vector<16x1xf32>, vector<16x15xf32> -> vector<16x16xf32>
      %32 = vector.extract_strided_slice %23 {offsets = [0, 1], sizes = [16, 15], strides = [1, 1]} : vector<16x16xf32> to vector<16x15xf32>
      %33 = vector.extract_strided_slice %23 {offsets = [0, 15], sizes = [16, 1], strides = [1, 1]} : vector<16x16xf32> to vector<16x1xf32>
      %34 = tpu.concatenate %32, %33 in 1 : vector<16x15xf32>, vector<16x1xf32> -> vector<16x16xf32>
      %35 = arith.maximumf %31, %23 : vector<16x16xf32>
      %36 = arith.maximumf %35, %34 : vector<16x16xf32>
      %cst_16 = arith.constant 0.000000e+00 : f32
      %37 = vector.broadcast %cst_16 : f32 to vector<16x16xf32>
      %38 = arith.select %26, %37, %31 : vector<16x16xi1>, vector<16x16xf32>
      %39 = arith.addf %38, %23 : vector<16x16xf32>
      %cst_17 = arith.constant 0.000000e+00 : f32
      %40 = vector.broadcast %cst_17 : f32 to vector<16x16xf32>
      %41 = arith.select %28, %40, %34 : vector<16x16xi1>, vector<16x16xf32>
      %42 = arith.addf %39, %41 : vector<16x16xf32>
      %cst_18 = arith.constant 0.333333343 : f32
      %43 = vector.broadcast %cst_18 : f32 to vector<16x16xf32>
      %44 = arith.mulf %42, %43 : vector<16x16xf32>
      %45 = arith.addf %36, %44 : vector<16x16xf32>
      %46 = vector.shape_cast %45 : vector<16x16xf32> to vector<1x16x16xf32>
      %47 = tpu.transpose %46, [0, 2, 1] : vector<1x16x16xf32> -> vector<1x16x16xf32>
      %48 = vector.shape_cast %47 : vector<1x16x16xf32> to vector<16x16xf32>
      %c0_19 = arith.constant 0 : index
      %c0_20 = arith.constant 0 : index
      %49 = vector.load %arg3[%c0_19, %c0_20] : memref<16x16xf32, #tpu.memory_space<vmem>>, vector<16x16xf32>
      %cst_21 = arith.constant dense<0.000000e+00> : vector<16x16xf32>
      %50 = tpu.matmul %48, %49, %cst_21 {dimension_numbers = #tpu.dot_dimension_numbers<[1], [0], [0], [1], [0, 0, 1, 1], [], []>} : vector<16x16xf32>, vector<16x16xf32>, vector<16x16xf32> -> vector<16x16xf32>
      %c0_22 = arith.constant 0 : index
      %c0_23 = arith.constant 0 : index
      %51 = vector.load %arg4[%c0_22, %c0_23] : memref<1x16xf32, #tpu.memory_space<vmem>>, vector<1x16xf32>
      %52 = vector.broadcast %51 : vector<1x16xf32> to vector<16x16xf32>
      %53 = arith.addf %50, %52 : vector<16x16xf32>
      %cst_24 = arith.constant 0.000000e+00 : f32
      %54 = vector.broadcast %cst_24 : f32 to vector<16x16xf32>
      %55 = arith.maximumf %53, %54 : vector<16x16xf32>
      %c0_25 = arith.constant 0 : index
      %c0_26 = arith.constant 0 : index
      %56 = vector.load %arg5[%c0_25, %c0_26] : memref<16x128xf32, #tpu.memory_space<vmem>>, vector<16x128xf32>
      %cst_27 = arith.constant dense<0.000000e+00> : vector<16x128xf32>
      %57 = tpu.matmul %55, %56, %cst_27 {dimension_numbers = #tpu.dot_dimension_numbers<[1], [0], [0], [1], [0, 0, 1, 1], [], []>} : vector<16x16xf32>, vector<16x128xf32>, vector<16x128xf32> -> vector<16x128xf32>
      %c0_28 = arith.constant 0 : index
      %c0_29 = arith.constant 0 : index
      %58 = vector.load %arg6[%c0_28, %c0_29] : memref<1x128xf32, #tpu.memory_space<vmem>>, vector<1x128xf32>
      %59 = vector.broadcast %58 : vector<1x128xf32> to vector<16x128xf32>
      %60 = arith.addf %57, %59 : vector<16x128xf32>
      %61 = vector.extract_strided_slice %60 {offsets = [0, 0], sizes = [16, 32], strides = [1, 1]} : vector<16x128xf32> to vector<16x32xf32>
      %62 = vector.extract_strided_slice %60 {offsets = [0, 32], sizes = [16, 32], strides = [1, 1]} : vector<16x128xf32> to vector<16x32xf32>
      %63 = arith.mulf %61, %62 : vector<16x32xf32>
      %64 = vector.shape_cast %63 : vector<16x32xf32> to vector<1x16x32xf32>
      %cst_30 = arith.constant dense<0.000000e+00> : vector<1x32xf32>
      %65 = vector.multi_reduction <add>, %64, %cst_30 [1] : vector<1x16x32xf32> to vector<1x32xf32>
      %66 = vector.extract_strided_slice %65 {offsets = [0, 0], sizes = [1, 8], strides = [1, 1]} : vector<1x32xf32> to vector<1x8xf32>
      %67 = vector.extract_strided_slice %65 {offsets = [0, 8], sizes = [1, 8], strides = [1, 1]} : vector<1x32xf32> to vector<1x8xf32>
      %68 = arith.addf %66, %67 : vector<1x8xf32>
      %69 = vector.extract_strided_slice %65 {offsets = [0, 16], sizes = [1, 8], strides = [1, 1]} : vector<1x32xf32> to vector<1x8xf32>
      %70 = arith.addf %68, %69 : vector<1x8xf32>
      %71 = vector.extract_strided_slice %65 {offsets = [0, 24], sizes = [1, 8], strides = [1, 1]} : vector<1x32xf32> to vector<1x8xf32>
      %72 = arith.addf %70, %71 : vector<1x8xf32>
      %cst_31 = arith.constant 0.000000e+00 : f32
      %73 = vector.broadcast %cst_31 : f32 to vector<1x120xf32>
      %74 = tpu.concatenate %72, %73 in 1 : vector<1x8xf32>, vector<1x120xf32> -> vector<1x128xf32>
      %c0_32 = arith.constant 0 : index
      %c0_33 = arith.constant 0 : index
      %c0_34 = arith.constant 0 : index
      %75 = vector.load %arg7[%c0_32, %c0_33, %c0_34] : memref<1x1x128xf32, #tpu.memory_space<vmem>>, vector<1x1x128xf32>
      %76 = vector.shape_cast %75 : vector<1x1x128xf32> to vector<1x128xf32>
      %77 = arith.addf %76, %74 : vector<1x128xf32>
      %c0_35 = arith.constant 0 : index
      %c0_36 = arith.constant 0 : index
      %c0_37 = arith.constant 0 : index
      %78 = vector.load %arg8[%c0_35, %c0_36, %c0_37] : memref<1x1x128xf32, #tpu.memory_space<vmem>>, vector<1x1x128xf32>
      %79 = vector.shape_cast %78 : vector<1x1x128xf32> to vector<1x128xf32>
      %80 = vector.shape_cast %77 : vector<1x128xf32> to vector<1x1x128xf32>
      tpu.vector_store %arg8[%c0_35, %c0_36, %c0_37], %80 {strides = array<i32>} : memref<1x1x128xf32, #tpu.memory_space<vmem>>, vector<1x1x128xf32>,
    } else {
    }
    return
  }
  func.func @transform_0(%arg0: i32, %arg1: i32) -> (i32, i32, i32, i32) {
    %c0_i32 = arith.constant 0 : i32
    %c0_i32_0 = arith.constant 0 : i32
    %c0_i32_1 = arith.constant 0 : i32
    return %arg0, %c0_i32, %arg1, %c0_i32_0 : i32, i32, i32, i32
  }
  func.func @transform_1(%arg0: i32, %arg1: i32) -> (i32, i32) {
    %c0_i32 = arith.constant 0 : i32
    %c0_i32_0 = arith.constant 0 : i32
    %c0_i32_1 = arith.constant 0 : i32
    return %c0_i32, %c0_i32_0 : i32, i32
  }
  func.func @transform_2(%arg0: i32, %arg1: i32) -> (i32, i32) {
    %c0_i32 = arith.constant 0 : i32
    %c0_i32_0 = arith.constant 0 : i32
    %c0_i32_1 = arith.constant 0 : i32
    return %c0_i32, %c0_i32_0 : i32, i32
  }
  func.func @transform_3(%arg0: i32, %arg1: i32) -> (i32, i32) {
    %c0_i32 = arith.constant 0 : i32
    %c0_i32_0 = arith.constant 0 : i32
    %c0_i32_1 = arith.constant 0 : i32
    return %c0_i32, %c0_i32_0 : i32, i32
  }
  func.func @transform_4(%arg0: i32, %arg1: i32) -> (i32, i32) {
    %c0_i32 = arith.constant 0 : i32
    %c0_i32_0 = arith.constant 0 : i32
    %c0_i32_1 = arith.constant 0 : i32
    return %c0_i32, %c0_i32_0 : i32, i32
  }
  func.func @transform_5(%arg0: i32, %arg1: i32) -> (i32, i32, i32) {
    %c0_i32 = arith.constant 0 : i32
    %c0_i32_0 = arith.constant 0 : i32
    %c0_i32_1 = arith.constant 0 : i32
    return %arg0, %c0_i32, %c0_i32_0 : i32, i32, i32
  }
  func.func @transform_6(%arg0: i32, %arg1: i32) -> (i32, i32, i32) {
    %c0_i32 = arith.constant 0 : i32
    %c0_i32_0 = arith.constant 0 : i32
    %c0_i32_1 = arith.constant 0 : i32
    return %arg0, %c0_i32, %c0_i32_0 : i32, i32, i32
  }
}

</mosaic_0001>

<bundles_post_ra>
// kernel: tpu_custom_call.1
= control target key start
LH: loop header
LB: loop body
LE: loop exit
PB: predicated region body
PF: predicated region fallthrough
CT: control target
= control target key end

     0   :  { %s1756_s0 = inlined_call_operand.hbm [shape: bf16[2,16,8,16], index: 0, kind: input, shape index: {}]   ;;  %s1757_s1 = inlined_call_operand.vmem [shape: f32[16,16], index: 1, kind: input, shape index: {}]   ;;  %s1758_s2 = inlined_call_operand.vmem [shape: f32[1,16], index: 2, kind: input, shape index: {}]   ;;  %s1759_s3 = inlined_call_operand.hbm [shape: f32[16,128], index: 3, kind: input, shape index: {}]   ;;  %s1760_s4 = inlined_call_operand.vmem [shape: f32[1,128], index: 4, kind: input, shape index: {}]   ;;  %s1761_s5 = inlined_call_operand.hbm [shape: f32[2,1,128], index: 5, kind: input, shape index: {}, may-alias: {5,6}]   ;;  %s1762_s6 = inlined_call_operand.hbm [shape: f32[2,1,128], index: 6, kind: output, shape index: {}, may-alias: {5,6}]  }
   0x1   :  { %1774 = sst [smem:[#allocation18_spill]] %s1756_s0 }
   0x2   :  { %11 = vsyncpa [#allocation4], 0 }
   0x3   :  { %13 = vsyncpa [#allocation4 + $0x1], 0 }
   0x4   :  { %14 = vsyncpa [#allocation7], 0 }
   0x5   :  { %15 = vsyncpa [#allocation5], 0 }
   0x6   :  { %17 = vsyncpa [#allocation5 + $0x1], 0  ;;  %s1417_s21 = smov 0   ;;  %s1419_s22 = smov 0  }
   0x7   :  { %s1421_s23 = smov 0   ;;  %s1423_s24 = smov 0  }
   0x8   :  { %s1425_s25 = smov 0   ;;  %s1427_s26 = smov 0  }
   0x9 LB: > { %1775 = sst [smem:[#allocation14_spill]] %s1361_s25  ;;  %s35_s27 = sadd.s32 1, %s1361_s25  ;;  %s1365_s26 = sphi %s1427_s26, %s23_s26   ;;  %s1361_s25 = sphi %s1425_s25, %s1799_s25   ;;  %s1357_s24 = sphi %s1423_s24, %s1798_s24   ;;  %s1353_s23 = sphi %s1421_s23, %s1802_s23   ;;  %s1349_s22 = sphi %s1419_s22, %s1801_s22   ;;  %s1345_s21 = sphi %s1417_s21, %s1800_s21  }
   0xa   : > { %1776 = sst [smem:[#allocation15_spill]] %s1365_s26  ;;  %s44_s28 = sadd.s32 1, %s1353_s23 }
   0xb   : > { %p37_p0 = scmp.ge.s32.totalorder %s35_s27, 2  ;;  %p51_p1 = scmp.ne.s32.totalorder %s1353_s23, %s1349_s22 }
   0xc   : > { %p52_p2 = scmp.eq.s32.totalorder %s1365_s26, 0  ;;  %p1116_p5 = scmp.lt.s32.totalorder %s1365_s26, 2 }
   0xd   : > { %s1804_s27 = smov (%p37_p0, %s35_s27), 0  ;;  %s239_s30 = sand.u32 1, %s1365_s26  }
   0xe   : > { %1777 = sst [smem:[#allocation16_spill]] %s1804_s27  ;;  %p53_p4 = por %p52_p2, %p51_p1 }
   0xf   : > { %s39_s29 = ssub.s32 %s1361_s25, %s1804_s27  ;;  %s241_s7 = sand.u32 1, %s1353_s23  }
  0x10   : > { %p42_p6 = scmp.eq.s32.totalorder %s39_s29, 0  ;;  %s1020_s8 = sshll.u32 %s1361_s25, 10 }
  0x11   : > { %s1004_s10 = sshll.u32 %s241_s7, 6  ;;  %s1779_s0 = sld [smem:[#allocation18_spill]] }
  0x12   : > { %s1465_s9 = scalar_select %p42_p6, %s1353_s23, %s44_s28  }
  0x13   : > { %p1474_p7 = pnand %p1116_p5, %p53_p4  ;;  %s243_s15 = scalar_lea.vmem [#allocation3], %s1004_s10 }
  0x14   : > { %1778 = sst [smem:[#allocation17_spill]] %s1465_s9  ;;  %s251_s16 = sshll.u32 %s243_s15, 4  ;;  %s1478_s16 = int_to_ptr.vmem [resolvable:$true] %s251_s16 }
  0x15   : > { %s1780_s14 = scalar_select %p1474_p7, 1, 0 }
  0x16   : > { %s1480_s17 = scalar_lea.sflag [#allocation4], %s239_s30  ;;  %p1768_p9 = pneg %p1474_p7 }
  0x17   : > { %s1472_s13 = scalar_lea.hbm %s1779_s0, %s1020_s8  ;;  %s1192_s28 = scalar_lea.hbm %s1779_s0, 2048 }
  0x18   : > { %s1187_s18 = scalar_lea.hbm %s1472_s13, 1024  ;;  %p1193_p12 = scmp.lt.u32.totalorder %s1472_s13, %s1779_s0 }
  0x19   : > { %p1188_p8 = scmp.ne.s32.totalorder %s1472_s13, %s1187_s18  ;;  %p1194_p13 = scmp.lt.u32.totalorder %s1192_s28, %s1187_s18 }
  0x1a   : > { %p1196_p2 = scmp.lt.u32.totalorder %s1187_s18, %s1472_s13 }
  0x1b   : > { %p1190_p10 = pnand %p1768_p9, %p1188_p8  ;;  %p1195_p0 = por %p1194_p13, %p1193_p12 }
  0x1d   : > { %p1191_p11 = pneg %p1190_p10  ;;  %p1197_p4 = por %p1196_p2, %p1195_p0 }
  0x1f   : > { %p1198_p5 = pnand %p1197_p4, %p1191_p11 }
  0x21   : > { %1201 = shalt.err (!%p1198_p5)
}
  0x22   : > { %s1202_s30 = scalar_lea.vmem %s1478_s16, 1024  ;;  %s1367_s10 = smov [#allocation3]  }
  0x23   : > { %p1203_p6 = scmp.ne.s32.totalorder %s1478_s16, %s1202_s30  ;;  %s1207_s11 = sshll.u32 %s1367_s10, 4  ;;  %s1208_s11 = int_to_ptr.vmem [resolvable:$false] %s1207_s11 }
  0x24   : > { %s1209_s12 = scalar_lea.vmem %s1208_s11, 2048  ;;  %p1210_p3 = scmp.lt.s32.totalorder %s1478_s16, %s1208_s11 }
  0x25   : > { %p1205_p8 = pnand %p1203_p6, %p1768_p9  ;;  %p1211_p12 = scmp.lt.s32.totalorder %s1209_s12, %s1202_s30 }
  0x27   : > { %p1206_p10 = pneg %p1205_p8  ;;  %p1212_p13 = por %p1211_p12, %p1210_p3 }
  0x29   : > { %p1213_p0 = pnand %p1212_p13, %p1206_p10 }
  0x2b   : > { %1216 = shalt.err (!%p1213_p0)
}
  0x2c   : > { %s1368_s15 = smov 64   ;;  %s1369_s18 = smov 4  }
  0x2d   : > { %1107 = dma.hbm_to_vmem [thread:$0]  (!%p1474_p7), %s1472_s13, 1024, %s1478_s16, %s1480_s17, %s1368_s15, %s1368_s15, %s1369_s18  }
  0x2e   : > { %s1509_s19 = sadd.s32 4294967295, %s1365_s26   ;;  %s1000_s20 = sadd.s32 4294967294, %s1365_s26  }
  0x2f   : > { %p57_p3 = scmp.ne.s32.totalorder %s1349_s22, %s1345_s21  ;;  %p1767_p11 = scmp.eq.s32.totalorder %s1509_s19, 0 }
  0x30   : > { %p191_p2 = scmp.eq.s32.totalorder %s1509_s19, 1  ;;  %p197_p4 = scmp.eq.s32.totalorder %s1000_s20, 1 }
  0x31   : > { %p1001_p5 = scmp.ge.s32.totalorder %s1365_s26, 1  ;;  %p1519_p6 = por %p1767_p11, %p57_p3 }
  0x32   : > { %p1526_p8 = por %p191_p2, %p51_p1  ;;  %p1530_p10 = por %p197_p4, %p57_p3 }
  0x33   : > { %s1781_s28 = scalar_select %p1519_p6, 1, 0 }
  0x34   : > { %s1782_s13 = scalar_select %p1526_p8, 1, 0 }
  0x35   : > { %s1783_s16 = scalar_select %p1530_p10, 1, 0 }
  0x36   : > { %p204_p12 = scmp.lt.s32.totalorder %s1365_s26, 3  ;;  %s1370_s8 = smov [#allocation6]  }
  0x37   : > { %s222_s30 = sshll.u32 %s1370_s8, 4  ;;  %s1007_s10 = sshll.u32 %s1361_s25, 4  ;;  %s1539_s30 = int_to_ptr.vmem [resolvable:$true] %s222_s30 }
  0x38   : > { %p1535_p13 = pnand %p1001_p5, %p204_p12  ;;  %s1553_s18 = scalar_lea.hbm %s1761_s5, %s1007_s10 }
  0x39   : > { %s264_s20 = scalar_lea.vmem [#allocation8], %s241_s7  ;;  %s1217_s25 = scalar_lea.hbm %s1759_s3, 256 }
  0x3a   : > { %s1784_s29 = scalar_select %p1535_p13, 1, 0 }
  0x3b   : > { %p1100_p0 = pneg %p1535_p13  ;;  %s271_s0 = sshll.u32 %s264_s20, 4  ;;  %s1557_s0 = int_to_ptr.vmem [resolvable:$true] %s271_s0 }
  0x3c   : > { %p1218_p3 = scmp.ne.s32.totalorder %s1759_s3, %s1217_s25  ;;  %p1224_p12 = scmp.lt.u32.totalorder %s1217_s25, %s1759_s3 }
  0x3d   : > { %p1546_p1 = pnand %p1100_p0, %p1767_p11 }
  0x3f   : > { %p1219_p2 = pneg %p1546_p1 }
  0x41   : > { %p1220_p4 = pnand %p1219_p2, %p1218_p3 }
  0x43   : > { %p1221_p5 = pneg %p1220_p4 }
  0x45   : > { %p1226_p0 = pnand %p1224_p12, %p1221_p5 }
  0x47   : > { %1229 = shalt.err (!%p1226_p0)
}
  0x48   : > { %s1230_s7 = scalar_lea.vmem %s1539_s30, 256  ;;  %p1238_p8 = scmp.lt.s32.totalorder %s1539_s30, %s1539_s30 }
  0x49   : > { %p1231_p11 = scmp.ne.s32.totalorder %s1539_s30, %s1230_s7  ;;  %p1239_p6 = scmp.lt.s32.totalorder %s1230_s7, %s1230_s7 }
  0x4b   : > { %p1233_p9 = pnand %p1231_p11, %p1219_p2  ;;  %p1240_p13 = por %p1239_p6, %p1238_p8 }
  0x4d   : > { %p1234_p10 = pneg %p1233_p9 }
  0x4f   : > { %p1241_p7 = pnand %p1240_p13, %p1234_p10 }
  0x51   : > { %1244 = shalt.err (!%p1241_p7)
}
  0x52   : > { %s1371_s26 = smov 128   ;;  %s1372_s25 = smov 8  }
  0x53   : > { %1103 = dma.hbm_to_vmem [thread:$0]  (!%p1546_p1), %s1759_s3, 256, %s1539_s30, [#allocation7], %s1371_s26, %s1371_s26, %s1372_s25  }
  0x54   : > { %s1245_s15 = scalar_lea.hbm %s1553_s18, 16  ;;  %p1786_p11 = scmp.ne.s32.totalorder %s1780_s14, 0 }
  0x55   : > { %p1246_p9 = scmp.ne.s32.totalorder %s1553_s18, %s1245_s15  ;;  %s1250_s12 = scalar_lea.hbm %s1761_s5, 32 }
  0x56   : > { %p1787_p6 = pneg %p1786_p11  ;;  %p1251_p10 = scmp.lt.u32.totalorder %s1553_s18, %s1761_s5 }
  0x57   : > { %p1252_p13 = scmp.lt.u32.totalorder %s1250_s12, %s1245_s15  ;;  %p1254_p2 = scmp.lt.u32.totalorder %s1245_s15, %s1553_s18 }
  0x58   : > { %p1248_p8 = pnand %p1246_p9, %p1787_p6 }
  0x59   : > { %p1253_p3 = por %p1252_p13, %p1251_p10 }
  0x5a   : > { %p1249_p7 = pneg %p1248_p8 }
  0x5b   : > { %p1255_p4 = por %p1254_p2, %p1253_p3 }
  0x5d   : > { %p1256_p5 = pnand %p1255_p4, %p1249_p7 }
  0x5f   : > { %1259 = shalt.err (!%p1256_p5)
}
  0x60   : > { %s1260_s30 = scalar_lea.vmem %s1557_s0, 16  ;;  %p1788_p12 = pmov %p1787_p6 }
  0x61   : > { %p1261_p1 = scmp.ne.s32.totalorder %s1557_s0, %s1260_s30  ;;  %s1373_s11 = smov [#allocation8]  }
  0x62   : > { %s1265_s26 = sshll.u32 %s1373_s11, 4  ;;  %s1266_s26 = int_to_ptr.vmem [resolvable:$false] %s1265_s26 }
  0x63   : > { %p1263_p0 = pnand %p1261_p1, %p1788_p12  ;;  %s1267_s25 = scalar_lea.vmem %s1266_s26, 32 }
  0x64   : > { %p1268_p6 = scmp.lt.s32.totalorder %s1557_s0, %s1266_s26  ;;  %p1269_p8 = scmp.lt.s32.totalorder %s1267_s25, %s1260_s30 }
  0x65   : > { %p1264_p9 = pneg %p1263_p0 }
  0x66   : > { %p1270_p10 = por %p1269_p8, %p1268_p6 }
  0x68   : > { %p1271_p13 = pnand %p1270_p10, %p1264_p9 }
  0x6a   : > { %1274 = shalt.err (!%p1271_p13)
}
  0x6b   : > { %1110 = dma.hbm_to_vmem [thread:$0]  (!%p1786_p11), %s1553_s18, 16, %s1557_s0, %s1480_s17  }
  0x6c   : > { %p1789_p7 = scmp.ne.s32.totalorder %s1784_s29, 0 }
  0x6d   : > { %s282_s27 = sand.u32 (!%p1789_p7), 1, %s1509_s19   ;;  %s1608_s9 = sand.u32 (!%p1789_p7), 1, %s1349_s22  }
  0x6e   : > { %280 = sbr.rel (%p1789_p7) target bundleno = 1185 (0x4a1), region = 44  ;;  %s1009_s15 = sshll.u32 (!%p1789_p7), %s1608_s9, 6 }
  0x6f   : > { %s283_s20 = scalar_lea.sflag (!%p1789_p7), [#allocation4], %s282_s27  ;;  %s1611_s8 = scalar_lea.vmem (!%p1789_p7), [#allocation3], %s1009_s15 }
  0x70   : > { %p1790_p3 = scmp.ne.s32.totalorder (!%p1789_p7), %s1781_s28, 0 }
  0x75   : > { %1328 = dma.done.wait (%p1790_p3), %s283_s20, 1024  }
  0x76   : > { %1330 = vsyncadd (%p1790_p3), %s283_s20, 4294966272  ;;  %p1791_p11 = scmp.eq.s32.totalorder %s1509_s19, 0 }
  0x78   : > { %1332 = dma.done.wait (%p1791_p11), [#allocation7], 256   ;;  %p1792_p2 = pmov %p1791_p11 }
  0x79   : > { %s298_s0 = scalar_lea.vmem [#allocation8], %s1608_s9 }
  0x7a   : > { %1334 = vsyncadd (%p1792_p2), [#allocation7], 4294967040 }
  0x7b   : > { %1336 = dma.done.wait (%p1790_p3), %s283_s20, 16  }
  0x7c   : > { %1338 = vsyncadd (%p1790_p3), %s283_s20, 4294967280  ;;  %vm410_vm0 = vcmask 130048   ;;  %v1374_v0 = vmov 0.0   ;;  %v1022_v1 = vld [vmem:[%s1611_s8] sm:$0xff]   ;;  %v1053_v2 = vld [vmem:[%s1611_s8 + $0x8] sm:$0xff]   ;;  %vm547_vm1 = vcmask 1041409  }
  0x7d   : > { %527 = vst.msk [vmem:[#allocation2] sm:$0xff] %vm410_vm0, %v1374_v0  ;;  %528 = vst.msk [vmem:[#allocation2 + $0x8] sm:$0xff] %vm410_vm0, %v1374_v0  ;;  %v1054_v3 = vld [vmem:[%s1611_s8 + $0x10] sm:$0xff]   ;;  %v1023_v4 = vunpack.c.l.bf16 %v1022_v1  ;;  %v1024_v5 = vunpack.c.h.bf16 %v1022_v1  ;;  %v1027_v6 = vunpack.c.l.bf16 %v1053_v2  ;;  %v1028_v7 = vunpack.c.h.bf16 %v1053_v2  ;;  %v1055_v8 = vld [vmem:[%s1611_s8 + $0x18] sm:$0xff]   ;;  %s1375_s14 = smov 1   ;;  %s1376_s17 = smov 127  }
  0x7e   : > { %v1633_v9 = vld [vmem:[%s1611_s8 + $0x20] sm:$0xff]   ;;  %v1031_v10 = vunpack.c.l.bf16 %v1054_v3  ;;  %v1032_v11 = vunpack.c.h.bf16 %v1054_v3  ;;  %v1035_v12 = vunpack.c.l.bf16 %v1055_v8  ;;  %v1036_v13 = vunpack.c.h.bf16 %v1055_v8  ;;  %s1377_s11 = smov 96   ;;  %s1378_s26 = smov 120  }
  0x7f   : > { %v362_v14 = vmax.f32 %v1023_v4, 1e-06  ;;  %v363_v15 = vmax.f32 %v1024_v5, 1e-06  ;;  %v364_v16 = vmax.f32 %v1027_v6, 1e-06  ;;  %v1039_v17 = vunpack.c.l.bf16 %v1633_v9 }
  0x80   : > { %v365_v18 = vmax.f32 %v1028_v7, 1e-06  ;;  %v366_v19 = vmax.f32 %v1031_v10, 1e-06  ;;  %v367_v20 = vmax.f32 %v1032_v11, 1e-06  ;;  %v1040_v21 = vunpack.c.h.bf16 %v1633_v9 }
  0x81   : > { %v368_v22 = vmax.f32 %v1035_v12, 1e-06  ;;  %v369_v23 = vmax.f32 %v1036_v13, 1e-06  ;;  %v378_v24 = vmul.f32 %v362_v14, %v362_v14  ;;  %v379_v25 = vmul.f32 %v363_v15, %v363_v15  ;;  %s1379_s25 = smov 112   ;;  %s1380_s27 = smov 104  }
  0x82   : > { %v380_v26 = vmul.f32 %v364_v16, %v364_v16  ;;  %v381_v27 = vmul.f32 %v365_v18, %v365_v18  ;;  %v382_v28 = vmul.f32 %v366_v19, %v366_v19  ;;  %v383_v29 = vmul.f32 %v367_v20, %v367_v20  ;;  %s1017_s15 = sshll.u32 %s1357_s24, 4  ;;  %s329_s20 = scalar_lea.vmem [#allocation9], %s1608_s9 }
  0x83   : > { %v384_v30 = vmul.f32 %v368_v22, %v368_v22  ;;  %v385_v31 = vmul.f32 %v369_v23, %v369_v23  ;;  %v394_v32 = vmul.f32 %v378_v24, %v362_v14  ;;  %v395_v33 = vmul.f32 %v379_v25, %v363_v15  ;;  %s1707_s19 = scalar_lea.hbm %s1762_s6, %s1017_s15  ;;  %s884_s28 = scalar_lea.sflag [#allocation5], %s1608_s9 }
  0x84   : > { %v396_v34 = vmul.f32 %v380_v26, %v364_v16  ;;  %v397_v35 = vmul.f32 %v381_v27, %v365_v18  ;;  %v398_v36 = vmul.f32 %v382_v28, %v366_v19  ;;  %v399_v37 = vmul.f32 %v383_v29, %v367_v20  ;;  %v1057_v20 = vld [vmem:[%s1611_s8 + $0x28] sm:$0xff]   ;;  %p1793_p5 = scmp.ne.s32.totalorder %s1782_s13, 0  ;;  %s1381_s24 = smov [#allocation9]  }
  0x85   : > { %v400_v38 = vmul.f32 %v384_v30, %v368_v22  ;;  %v401_v39 = vmul.f32 %v385_v31, %v369_v23  ;;  %v411_v40 = vsel %vm410_vm0, %v394_v32, 0.0  ;;  %v418_v41 = vsel %vm410_vm0, %v395_v33, 0.0  ;;  %v1058_v30 = vld [vmem:[%s1611_s8 + $0x30] sm:$0xff]   ;;  %v1059_v31 = vld [vmem:[%s1611_s8 + $0x38] sm:$0xff]   ;;  %s896_s8 = sshll.u32 %s329_s20, 4  ;;  %s1709_s8 = int_to_ptr.vmem [resolvable:$true] %s896_s8 }
  0x86   : > { %v412_v42 = vrot.slane %v411_v40, 4  ;;  %v419_v43 = vrot.slane %v418_v41, 4  ;;  %v425_v44 = vsel %vm410_vm0, %v396_v34, 0.0  ;;  %v432_v45 = vsel %vm410_vm0, %v397_v35, 0.0  ;;  %s1275_s29 = scalar_lea.vmem %s1709_s8, 16 }
  0x87   : > { %v426_v46 = vrot.slane %v425_v44, 4  ;;  %v433_v47 = vrot.slane %v432_v45, 4  ;;  %v439_v48 = vsel %vm410_vm0, %v398_v36, 0.0  ;;  %v446_v49 = vsel %vm410_vm0, %v399_v37, 0.0  ;;  %p1276_p4 = scmp.ne.s32.totalorder %s1709_s8, %s1275_s29 }
  0x88   : > { %v413_v50 = vadd.f32 %v412_v42, %v411_v40  ;;  %v420_v51 = vadd.f32 %v419_v43, %v418_v41  ;;  %v440_v52 = vrot.slane %v439_v48, 4  ;;  %v447_v53 = vrot.slane %v446_v49, 4 }
  0x89   : > { %vm549_vm2 = vcmask 1042434   ;;  %v427_v54 = vadd.f32 %v426_v46, %v425_v44  ;;  %v434_v55 = vadd.f32 %v433_v47, %v432_v45  ;;  %v453_v56 = vsel %vm410_vm0, %v400_v38, 0.0  ;;  %v529_v46 = vld [vmem:[#allocation2] sm:$0xff]  ;;  %p1277_p1 = pnand %p1276_p4, %p1793_p5 }
  0x8a   : > { %v460_v57 = vsel %vm410_vm0, %v401_v39, 0.0  ;;  %vm551_vm3 = vcmask 1043459   ;;  %v414_v58 = vrot.slane %v413_v50, 2  ;;  %v421_v59 = vrot.slane %v420_v51, 2 }
  0x8b   : > { %v441_v60 = vadd.f32 %v440_v52, %v439_v48  ;;  %v448_v61 = vadd.f32 %v447_v53, %v446_v49  ;;  %vm553_vm4 = vcmask 1044484   ;;  %v428_v62 = vrot.slane %v427_v54, 2  ;;  %p1278_p12 = pneg %p1277_p1 }
  0x8c   : > { %v435_v63 = vrot.slane %v434_v55, 2  ;;  %v454_v0 = vrot.slane %v453_v56, 4  ;;  %v461_v1 = vrot.slane %v460_v57, 4  ;;  %vm555_vm5 = vcmask 1045509  }
  0x8d   : > { %v415_v2 = vadd.f32 %v414_v58, %v413_v50  ;;  %v422_v3 = vadd.f32 %v421_v59, %v420_v51  ;;  %v442_v4 = vrot.slane %v441_v60, 2  ;;  %v449_v5 = vrot.slane %v448_v61, 2 }
  0x8e   : > { %vm557_vm6 = vcmask 1046534   ;;  %v429_v6 = vadd.f32 %v428_v62, %v427_v54  ;;  %v436_v7 = vadd.f32 %v435_v63, %v434_v55  ;;  %v455_v8 = vadd.f32 %v454_v0, %v453_v56 }
  0x8f   : > { %v462_v10 = vadd.f32 %v461_v1, %v460_v57  ;;  %vm559_vm7 = vcmask 1047559   ;;  %v416_v11 = vrot.slane %v415_v2, 1  ;;  %v423_v12 = vrot.slane %v422_v3, 1 }
  0x90   : > { %v443_v13 = vadd.f32 %v442_v4, %v441_v60  ;;  %v450_v14 = vadd.f32 %v449_v5, %v448_v61  ;;  %v430_v15 = vrot.slane %v429_v6, 1  ;;  %v437_v16 = vrot.slane %v436_v7, 1 }
  0x91   : > { %v456_v18 = vrot.slane %v455_v8, 2  ;;  %v463_v19 = vrot.slane %v462_v10, 2  ;;  %v417_v22 = vadd.f32 %v416_v11, %v415_v2  ;;  %v424_v23 = vadd.f32 %v423_v12, %v422_v3 }
  0x92   : > { %v444_v24 = vrot.slane %v443_v13, 1  ;;  %v451_v25 = vrot.slane %v450_v14, 1  ;;  %v431_v26 = vadd.f32 %v430_v15, %v429_v6  ;;  %v438_v27 = vadd.f32 %v437_v16, %v436_v7 }
  0x93   : > { %v457_v28 = vadd.f32 %v456_v18, %v455_v8  ;;  %v464_v29 = vadd.f32 %v463_v19, %v462_v10  ;;  %v548_v34 = vsel %vm547_vm1, %v424_v23, %v417_v22  ;;  %v1043_v35 = vunpack.c.l.bf16 %v1057_v20 }
  0x94   : > { %v445_v32 = vadd.f32 %v444_v24, %v443_v13  ;;  %v452_v33 = vadd.f32 %v451_v25, %v450_v14  ;;  %v550_v38 = vsel %vm549_vm2, %v431_v26, %v548_v34  ;;  %v1044_v39 = vunpack.c.h.bf16 %v1057_v20 }
  0x95   : > { %v458_v36 = vrot.slane %v457_v28, 1  ;;  %v465_v37 = vrot.slane %v464_v29, 1  ;;  %v552_v40 = vsel %vm551_vm3, %v438_v27, %v550_v38  ;;  %v1047_v41 = vunpack.c.l.bf16 %v1058_v30 }
  0x96   : > { %v1048_v42 = vunpack.c.h.bf16 %v1058_v30  ;;  %v1051_v43 = vunpack.c.l.bf16 %v1059_v31  ;;  %v554_v47 = vsel %vm553_vm4, %v445_v32, %v552_v40  ;;  %v1052_v48 = vunpack.c.h.bf16 %v1059_v31 }
  0x97   : > { %v459_v44 = vadd.f32 %v458_v36, %v457_v28  ;;  %v466_v45 = vadd.f32 %v465_v37, %v464_v29  ;;  %v556_v49 = vsel %vm555_vm5, %v452_v33, %v554_v47  ;;  %v370_v50 = vmax.f32 %v1039_v17, 1e-06 }
  0x98   : > { %v371_v51 = vmax.f32 %v1040_v21, 1e-06  ;;  %v372_v52 = vmax.f32 %v1043_v35, 1e-06  ;;  %v373_v54 = vmax.f32 %v1044_v39, 1e-06 }
  0x99   : > { %v558_v53 = vsel %vm557_vm6, %v459_v44, %v556_v49  ;;  %v374_v55 = vmax.f32 %v1047_v41, 1e-06  ;;  %v375_v56 = vmax.f32 %v1048_v42, 1e-06  ;;  %v376_v58 = vmax.f32 %v1051_v43, 1e-06 }
  0x9a   : > { %v560_v57 = vsel %vm559_vm7, %v466_v45, %v558_v53  ;;  %v377_v59 = vmax.f32 %v1052_v48, 1e-06  ;;  %v386_v60 = vmul.f32 %v370_v50, %v370_v50  ;;  %v387_v62 = vmul.f32 %v371_v51, %v371_v51 }
  0x9b   : > { %v570_v61 = vadd.f32 %v560_v57, %v529_v46  ;;  %v388_v63 = vmul.f32 %v372_v52, %v372_v52  ;;  %v389_v0 = vmul.f32 %v373_v54, %v373_v54  ;;  %v390_v1 = vmul.f32 %v374_v55, %v374_v55 }
  0x9c   : > { %v391_v17 = vmul.f32 %v375_v56, %v375_v56  ;;  %v392_v2 = vmul.f32 %v376_v58, %v376_v58  ;;  %v393_v9 = vmul.f32 %v377_v59, %v377_v59  ;;  %v402_v21 = vmul.f32 %v386_v60, %v370_v50 }
  0x9d   : > { %572 = vst.msk [vmem:[#allocation2] sm:$0xff] %vm410_vm0, %v570_v61  ;;  %v403_v3 = vmul.f32 %v387_v62, %v371_v51  ;;  %v404_v4 = vmul.f32 %v388_v63, %v372_v52  ;;  %v405_v5 = vmul.f32 %v389_v0, %v373_v54  ;;  %v406_v6 = vmul.f32 %v390_v1, %v374_v55 }
  0x9e   : > { %v407_v7 = vmul.f32 %v391_v17, %v375_v56  ;;  %v408_v8 = vmul.f32 %v392_v2, %v376_v58  ;;  %v409_v10 = vmul.f32 %v393_v9, %v377_v59  ;;  %v467_v11 = vsel %vm410_vm0, %v402_v21, 0.0 }
  0x9f   : > { %v474_v12 = vsel %vm410_vm0, %v403_v3, 0.0  ;;  %v481_v13 = vsel %vm410_vm0, %v404_v4, 0.0  ;;  %v488_v14 = vsel %vm410_vm0, %v405_v5, 0.0  ;;  %v468_v15 = vrot.slane %v467_v11, 4 }
  0xa0   : > { %v475_v16 = vrot.slane %v474_v12, 4  ;;  %v482_v18 = vrot.slane %v481_v13, 4  ;;  %v489_v19 = vrot.slane %v488_v14, 4  ;;  %v495_v20 = vsel %vm410_vm0, %v406_v6, 0.0 }
  0xa1   : > { %v502_v22 = vsel %vm410_vm0, %v407_v7, 0.0  ;;  %v509_v23 = vsel %vm410_vm0, %v408_v8, 0.0  ;;  %v516_v24 = vsel %vm410_vm0, %v409_v10, 0.0  ;;  %v469_v25 = vadd.f32 %v468_v15, %v467_v11  ;;  %v530_v10 = vld [vmem:[#allocation2 + $0x8] sm:$0xff] }
  0xa2   : > { %v476_v26 = vadd.f32 %v475_v16, %v474_v12  ;;  %v483_v27 = vadd.f32 %v482_v18, %v481_v13  ;;  %v490_v28 = vadd.f32 %v489_v19, %v488_v14  ;;  %v496_v29 = vrot.slane %v495_v20, 4 }
  0xa3   : > { %v503_v30 = vrot.slane %v502_v22, 4  ;;  %v510_v31 = vrot.slane %v509_v23, 4  ;;  %v517_v32 = vrot.slane %v516_v24, 4  ;;  %v470_v34 = vrot.slane %v469_v25, 2 }
  0xa4   : > { %v577_v33 = vld [vmem:[#allocation2] sm:$0xff]  ;;  %v477_v35 = vrot.slane %v476_v26, 2  ;;  %v484_v36 = vrot.slane %v483_v27, 2  ;;  %v491_v37 = vrot.slane %v490_v28, 2  ;;  %v497_v39 = vadd.f32 %v496_v29, %v495_v20 }
  0xa5   : > { %v579_v38 = vmul.f32 0.125, %v577_v33  ;;  %v504_v40 = vadd.f32 %v503_v30, %v502_v22  ;;  %v511_v41 = vadd.f32 %v510_v31, %v509_v23  ;;  %v471_v42 = vadd.f32 %v470_v34, %v469_v25 }
  0xa6   : > { %v478_v43 = vadd.f32 %v477_v35, %v476_v26  ;;  %v485_v44 = vadd.f32 %v484_v36, %v483_v27  ;;  %v492_v45 = vadd.f32 %v491_v37, %v490_v28  ;;  %v498_v46 = vrot.slane %v497_v39, 2 }
  0xa7   : > { %1179 = vlog2.f32 %v579_v38  ;;  %v505_v47 = vrot.slane %v504_v40, 2  ;;  %v512_v48 = vrot.slane %v511_v41, 2  ;;  %v472_v49 = vrot.slane %v471_v42, 1 }
  0xa8   : > { %v479_v50 = vrot.slane %v478_v43, 1  ;;  %v486_v51 = vrot.slane %v485_v44, 1  ;;  %v493_v52 = vrot.slane %v492_v45, 1  ;;  %v499_v53 = vadd.f32 %v498_v46, %v497_v39 }
  0xa9   : > { %v506_v54 = vadd.f32 %v505_v47, %v504_v40  ;;  %v513_v55 = vadd.f32 %v512_v48, %v511_v41  ;;  %v518_v56 = vadd.f32 %v517_v32, %v516_v24  ;;  %v473_v57 = vadd.f32 %v472_v49, %v471_v42 }
  0xaa   : > { %v480_v58 = vadd.f32 %v479_v50, %v478_v43  ;;  %v487_v59 = vadd.f32 %v486_v51, %v485_v44  ;;  %v494_v60 = vadd.f32 %v493_v52, %v492_v45  ;;  %v500_v61 = vrot.slane %v499_v53, 1  ;;  %v663_v51 = vld [vmem:[%s1757_s1] sm:$0xff]  ;;  %v664_v52 = vld [vmem:[%s1757_s1 + $0x8] sm:$0xff] }
  0xab   : > { %v507_v62 = vrot.slane %v506_v54, 1  ;;  %v514_v63 = vrot.slane %v513_v55, 1  ;;  %v519_v0 = vrot.slane %v518_v56, 2  ;;  %v591_v28 = vlaneseq }
  0xac   : > { %v561_v1 = vsel %vm547_vm1, %v480_v58, %v473_v57  ;;  %v501_v17 = vadd.f32 %v500_v61, %v499_v53  ;;  %vm603_vm8 = vcmask 7168   ;;  %vm612_vm9 = vcmask 121856  }
  0xad   : > { %v508_v2 = vadd.f32 %v507_v62, %v506_v54  ;;  %v520_v9 = vadd.f32 %v519_v0, %v518_v56  ;;  %v515_v21 = vadd.f32 %v514_v63, %v513_v55  ;;  %v562_v3 = vsel %vm549_vm2, %v487_v59, %v561_v1  ;;  %v755_v59 = vld [vmem:[#allocation6] sm:$0xff] }
  0xae   : > { %v563_v5 = vsel %vm551_vm3, %v494_v60, %v562_v3  ;;  %v592_v29 = vand.u32 127, %v591_v28  ;;  %v1082_v53 = vpack.c.bf16 %v664_v52, %v663_v51  ;;  %v756_v60 = vld [vmem:[#allocation6 + $0x8] sm:$0xff]  ;;  %v1011_v62 = vld [vmem:[%s1758_s2] ss:$0 sm:$0xff]  ;;  %vm855_vm12 = vcmask 261120  }
  0xaf   : > { %v521_v4 = vrot.slane %v520_v9, 1  ;;  %v564_v6 = vsel %vm553_vm4, %v501_v17, %v563_v5  ;;  %v1086_v61 = vpack.c.bf16 %v756_v60, %v755_v59  ;;  %vm878_vm13 = vcmask 64512   ;;  %v880_v28 = vld [vmem:[%s298_s0] sm:$0x1]  ;;  %s1279_s0 = sshll.u32 %s1381_s24, 4  ;;  %s1280_s0 = int_to_ptr.vmem [resolvable:$false] %s1279_s0 }
  0xb0   : > { %v565_v11 = vsel %vm555_vm5, %v508_v2, %v564_v6  ;;  %vm593_vm10 = vcmp.eq.s32.totalorder %v592_v29, 0  ;;  %vm594_vm11 = vcmp.eq.s32.totalorder %v592_v29, 15  ;;  %1083 = vmatprep.subr.bf16.mxu0 %v1082_v53  ;;  %s1281_s18 = scalar_lea.vmem %s1280_s0, 32  ;;  %p1282_p0 = scmp.lt.s32.totalorder %s1709_s8, %s1280_s0 }
  0xb1   : > { %v1180_v7 = vpop.eup %1179  ;;  %v522_v8 = vadd.f32 %v521_v4, %v520_v9  ;;  %v566_v13 = vsel %vm557_vm6, %v515_v21, %v565_v11  ;;  %1085 = vmatpush3.bf16.msra.mxu0 %v1082_v53  ;;  %1087 = vmatprep.subr.bf16.mxu1 %v1086_v61  ;;  %v1014_v21 = vld [vmem:[%s1760_s4] ss:$0 sm:$0xff]  ;;  %p1283_p9 = scmp.lt.s32.totalorder %s1281_s18, %s1275_s29 }
  0xb2   : > { %v582_v12 = vmul.f32 0.6931472, %v1180_v7  ;;  %1089 = vmatpush3.bf16.msra.mxu1 %v1086_v61 }
  0xb3   : > { %v567_v14 = vsel %vm559_vm7, %v522_v8, %v566_v13  ;;  %p1284_p6 = por %p1283_p9, %p1282_p0 }
  0xb4   : > { %v585_v15 = vmul.f32 0.33333334, %v582_v12  ;;  %v571_v16 = vadd.f32 %v567_v14, %v530_v10 }
  0xb5   : > { %p1285_p8 = pnand %p1284_p6, %p1278_p12 }
  0xb6   : > { %v587_v18 = vmul.f32 1.442695, %v585_v15  ;;  %573 = vst.msk [vmem:[#allocation2 + $0x8] sm:$0xff] %vm410_vm0, %v571_v16 }
  0xb8   : > { %1181 = vpow2.f32 %v587_v18 }
  0xbd   : > { %v578_v19 = vld [vmem:[#allocation2 + $0x8] sm:$0xff] }
  0xbe   : > { %v580_v20 = vmul.f32 0.125, %v578_v19 }
  0xc0   : > { %1183 = vlog2.f32 %v580_v20 }
  0xc2   : > { %v1182_v22 = vpop.eup %1181 }
  0xc3   : > { %597 = vrot.lane.b32.xlu0 %v1182_v22, %s1375_s14  ;;  %606 = vrot.lane.b32.xlu1 %v1182_v22, %s1376_s17 }
  0xca   : > { %v1184_v23 = vpop.eup %1183 }
  0xcb   : > { %v584_v24 = vmul.f32 0.6931472, %v1184_v23 }
  0xcd   : > { %v586_v25 = vmul.f32 0.33333334, %v584_v24 }
  0xcf   : > { %v589_v26 = vmul.f32 1.442695, %v586_v25 }
  0xd1   : > { %1185 = vpow2.f32 %v589_v26 }
  0xdb   : > { %v1186_v27 = vpop.eup %1185 }
  0xdc   : > { %599 = vrot.lane.b32.xlu0 %v1186_v27, %s1375_s14  ;;  %608 = vrot.lane.b32.xlu1 %v1186_v27, %s1376_s17 }
 0x135   : > { %v598_v30 = vpop.permute.xlu0 %597  ;;  %v607_v31 = vpop.permute.xlu1 %606 }
 0x136   : > { %v604_v32 = vsel %vm603_vm8, %v1182_v22, %v598_v30  ;;  %v613_v33 = vsel %vm612_vm9, %v607_v31, %v1182_v22 }
 0x137   : > { %v619_v34 = vsel %vm593_vm10, 0.0, %v604_v32  ;;  %v623_v35 = vsel %vm594_vm11, 0.0, %v613_v33  ;;  %v615_v36 = vmax.f32 %v604_v32, %v1182_v22 }
 0x138   : > { %v621_v37 = vadd.f32 %v1182_v22, %v619_v34 }
 0x139   : > { %v617_v39 = vmax.f32 %v615_v36, %v613_v33 }
 0x13a   : > { %v625_v38 = vadd.f32 %v623_v35, %v621_v37 }
 0x13c   : > { %v627_v40 = vmul.f32 0.33333334, %v625_v38 }
 0x13e   : > { %v629_v41 = vadd.f32 %v627_v40, %v617_v39 }
 0x140   : > { %631 = vxpose.xlu0.b32.start [1/2] (short) (narrow) %v629_v41, 16 }
 0x14e   : > { %v600_v42 = vpop.permute.xlu0 %599  ;;  %v609_v43 = vpop.permute.xlu1 %608 }
 0x14f   : > { %v605_v44 = vsel %vm603_vm8, %v1186_v27, %v600_v42  ;;  %v614_v45 = vsel %vm612_vm9, %v609_v43, %v1186_v27 }
 0x150   : > { %v620_v46 = vsel %vm593_vm10, 0.0, %v605_v44  ;;  %v624_v47 = vsel %vm594_vm11, 0.0, %v614_v45  ;;  %v616_v48 = vmax.f32 %v605_v44, %v1186_v27 }
 0x151   : > { %v622_v49 = vadd.f32 %v1186_v27, %v620_v46 }
 0x152   : > { %v618_v54 = vmax.f32 %v616_v48, %v614_v45 }
 0x153   : > { %v626_v50 = vadd.f32 %v624_v47, %v622_v49 }
 0x155   : > { %v628_v55 = vmul.f32 0.33333334, %v626_v50 }
 0x157   : > { %v630_v56 = vadd.f32 %v628_v55, %v618_v54 }
 0x159   : > { %632 = vxpose.xlu0.b32.end [2/2] (short) (narrow) %v630_v56, 16 }
 0x1d5   : > { %v647_v57 = vpop.trf.xlu0 }
 0x1d6   : > { %1072 = vmatprep.mubr.msk.f32.mxu0 %vm410_vm0, %v647_v57 }
 0x1d9   : > { %v648_v58 = vpop.trf.xlu0 }
 0x1da   : > { %1073 = vmatmul.mubr.msk.f32.vlgmr.msra.gmra.mrb[0].mxu0 %vm410_vm0, %v648_v58 }
 0x2ad   : > { %v1074_v63 = vpop.f32.mrb[0].mxu0 }
 0x2ae   : > { %v750_v0 = vadd.f32 %v1074_v63, %v1011_v62  ;;  %v744_v1 = vpop.f32.mrb[1].mxu0 }
 0x2af   : > { %v745_v17 = vadd.f32 %v1011_v62, %v744_v1 }
 0x2b0   : > { %v754_v9 = vmax.f32 %v750_v0, 0.0 }
 0x2b1   : > { %v753_v2 = vmax.f32 %v745_v17, 0.0 }
 0x2b3   : > { %1079 = vmatprep.mubr.msk.f32.mxu1 %vm410_vm0, %v753_v2 }
 0x2b4   : > { %1080 = vmatmul.mubr.msk.f32.vlgmr.msra.gmra.mrb[0].mxu1 %vm410_vm0, %v754_v9 }
 0x387   : > { %v1081_v3 = vpop.f32.mrb[0].mxu1 }
 0x388   : > { %v836_v4 = vpop.f32.mrb[1].mxu1  ;;  %v842_v6 = vadd.f32 %v1081_v3, %v1014_v21 }
 0x389   : > { %v837_v5 = vadd.f32 %v1014_v21, %v836_v4 }
 0x38b   : > { %847 = vrot.lane.b32.xlu1 %v837_v5, %s1377_s11 }
 0x38f   : > { %849 = vrot.lane.b32.xlu1 %v842_v6, %s1377_s11 }
 0x3fd   : > { %v848_v7 = vpop.permute.xlu1 %847 }
 0x3fe   : > { %v853_v8 = vmul.f32 %v848_v7, %v837_v5 }
 0x400   : > { %v856_v12 = vsel %vm855_vm12, %v853_v8, 0.0 }
 0x401   : > { %v850_v10 = vpop.permute.xlu1 %849 }
 0x402   : > { %v854_v11 = vmul.f32 %v850_v10, %v842_v6 }
 0x404   : > { %v857_v13 = vsel %vm855_vm12, %v854_v11, 0.0 }
 0x405   : > { %v858_v14 = vadd.f32 %v857_v13, %v856_v12 }
 0x407   : > { %v859_v15 = vrot.slane %v858_v14, 4 }
 0x409   : > { %v860_v16 = vadd.f32 %v859_v15, %v858_v14 }
 0x40b   : > { %v861_v18 = vrot.slane %v860_v16, 2 }
 0x40d   : > { %v862_v19 = vadd.f32 %v861_v18, %v860_v16 }
 0x40f   : > { %v863_v20 = vrot.slane %v862_v19, 1 }
 0x411   : > { %v864_v22 = vadd.f32 %v863_v20, %v862_v19 }
 0x413   : > { %866 = vrot.lane.b32.xlu1 %v864_v22, %s1378_s26 }
 0x417   : > { %870 = vrot.lane.b32.xlu1 %v864_v22, %s1379_s25 }
 0x41b   : > { %874 = vrot.lane.b32.xlu1 %v864_v22, %s1380_s27 }
 0x485   : > { %v867_v23 = vpop.permute.xlu1 %866 }
 0x486   : > { %v869_v25 = vadd.f32 %v867_v23, %v864_v22 }
 0x489   : > { %v871_v24 = vpop.permute.xlu1 %870 }
 0x48a   : > { %v873_v26 = vadd.f32 %v871_v24, %v869_v25 }
 0x48d   : > { %v875_v27 = vpop.permute.xlu1 %874 }
 0x48e   : > { %v877_v29 = vadd.f32 %v875_v27, %v873_v26 }
 0x490   : > { %v879_v30 = vsel %vm878_vm13, %v877_v29, 0.0 }
 0x491   : > { %v881_v31 = vadd.f32 %v880_v28, %v879_v30 }
 0x493   : > { %882 = vst [vmem:[%s329_s20] sm:$0x1] %v881_v31 }
 0x494   : > { %1288 = shalt.err (!%p1285_p8)
}
 0x495   : > { %s1289_s9 = scalar_lea.hbm %s1707_s19, 16  ;;  %s1293_s7 = scalar_lea.hbm %s1762_s6, 32 }
 0x496   : > { %p1290_p10 = scmp.ne.s32.totalorder %s1707_s19, %s1289_s9  ;;  %p1294_p3 = scmp.lt.u32.totalorder %s1707_s19, %s1762_s6 }
 0x497   : > { %p1295_p11 = scmp.lt.u32.totalorder %s1293_s7, %s1289_s9  ;;  %p1297_p4 = scmp.lt.u32.totalorder %s1289_s9, %s1707_s19 }
 0x498   : > { %p1291_p13 = pnand %p1290_p10, %p1793_p5 }
 0x499   : > { %p1296_p2 = por %p1295_p11, %p1294_p3 }
 0x49a   : > { %p1292_p7 = pneg %p1291_p13 }
 0x49b   : > { %p1298_p1 = por %p1297_p4, %p1296_p2 }
 0x49d   : > { %p1299_p12 = pnand %p1298_p1, %p1292_p7 }
 0x49f   : > { %1302 = shalt.err (!%p1299_p12)
}
 0x4a0   : > { %1098 = dma.vmem_to_hbm [thread:$0]  (%p1793_p5), %s1709_s8, 16, %s1707_s19, %s884_s28  }
 0x4a1 PF: > { %s1794_s26 = sld [smem:[#allocation15_spill]]  ;;  %s908_s25 = sand.u32 1, %s1345_s21  }
 0x4a2   : > { %p1795_p0 = scmp.ne.s32.totalorder %s1783_s16, 0  ;;  %s909_s27 = scalar_lea.sflag [#allocation5], %s908_s25 }
 0x4a7   : > { %p1796_p9 = scmp.ge.s32.totalorder %s1794_s26, 2 }
 0x4a9   : > { %p1112_p6 = pnand %p1796_p9, %p1795_p0 }
 0x4ab   : > { %1340 = dma.done.wait (!%p1112_p6), %s909_s27, 16  }
 0x4ac   : > { %1342 = vsyncadd (!%p1112_p6), %s909_s27, 4294967280  ;;  %s23_s26 = sadd.s32 1, %s1794_s26   ;;  %s1797_s13 = sld [smem:[#allocation17_spill]] }
 0x4ad   : > { %p20_p8 = scmp.ge.s32.totalorder %s23_s26, 4   ;;  %s1798_s24 = sld [smem:[#allocation14_spill]] }
 0x4ae   : > { %s1799_s25 = sld [smem:[#allocation16_spill]]  ;;  %s1800_s21 = smov %s1349_s22 }
 0x4af   : > { %s1801_s22 = smov %s1353_s23  ;;  %22 = sbr.rel (!%p20_p8) target bundleno = 9 (0x9), region = 112 }
 0x4b2   : > { %s1802_s23 = smov %s1797_s13 }
 0x4b6   :  { %913 = vsyncpa [#allocation4], 1 }
 0x4b7   :  { %915 = vsyncpa [#allocation4 + $0x1], 1 }
 0x4b8   :  { %916 = vsyncpa [#allocation7], 1 }
 0x4b9   :  { %917 = vsyncpa [#allocation5], 1 }
 0x4ba   :  { %919 = vsyncpa [#allocation5 + $0x1], 1 }

</bundles_post_ra>
